<compile_context>
chip_gen: v7x
topology: tpu7x:2x2x1
jax: 0.10.0
libtpu: 0.0.40
codegen_flags: <defaults>
</compile_context>

<pallas_src>
import functools

import numpy as np
import jax
import jax.numpy as jnp
from jax.experimental import pallas as pl
from jax.experimental.pallas import tpu as pltpu

INV_SQRT10 = float(1.0 / np.sqrt(10.0))
_VMEM_BUDGET_BYTES = 12 * 1024 * 1024   # conservative across v5e / v6e / v7x


def _resblock_kernel(*refs, has_skip_weight):
    if has_skip_weight:
        aff_ref, x_ref, wskip_ref, w1_ref, b1_ref, w2_ref, b2_ref, o_ref = refs
    else:
        aff_ref, x_ref, w1_ref, b1_ref, w2_ref, b2_ref, o_ref = refs
        wskip_ref = None

    # Affine scalars live in SMEM (scalar prefetch): [gain1, bias1, gain2, bias2]
    g1 = aff_ref[0]
    a1 = aff_ref[1]
    g2 = aff_ref[2]
    a2 = aff_ref[3]

    x = x_ref[...]                                   # f32 (tile_b, in)

    # Branch 1: Affine -> Tanh in f32 (VPU + EUP), then bf16 matmul with f32 accumulate.
    h1 = jnp.tanh(x * g1 + a1)
    d1 = jnp.dot(h1.astype(w1_ref.dtype), w1_ref[...],
                 preferred_element_type=jnp.float32)

    # Fuse '/sqrt(10)' with gain2 into one scale:
    #   tanh(((d1 + b1) * inv_sqrt10) * g2 + a2) == tanh(d1 * s + (b1 * s + a2))
    s = g2 * INV_SQRT10
    c = b1_ref[...] * s + a2                         # (1, out) -- negligible
    h2 = jnp.tanh(d1 * s + c)

    d2 = jnp.dot(h2.astype(w2_ref.dtype), w2_ref[...],
                 preferred_element_type=jnp.float32)
    o2 = (d2 + b2_ref[...]) * INV_SQRT10

    # Skip path: real Linear only when in != out; identity skip is a plain VPU add.
    if has_skip_weight:
        o2 = o2 + jnp.dot(x.astype(wskip_ref.dtype), wskip_ref[...],
                          preferred_element_type=jnp.float32)
    else:
        o2 = o2 + x

    o_ref[...] = o2.astype(o_ref.dtype)


def _pick_tile_b(batch, in_size, out_size, weight_bytes):
    """Largest batch tile whose resident weights + double-buffered activations fit the budget."""
    tile = min(batch, 512)

    def footprint(t):
        # 2x double-buffered f32 input/output tiles + bf16 matmul-operand temporaries.
        act = 2 * t * (in_size + out_size) * 4 + t * (in_size + out_size) * 2
        return weight_bytes + act

    while tile > 8 and footprint(tile) > _VMEM_BUDGET_BYTES:
        tile //= 2
    if tile < batch:
        tile = max(8, (tile // 8) * 8)   # keep sublane (8) alignment when actually tiling
    return max(1, tile)


def resblock_forward(x, params, *, matmul_dtype=jnp.bfloat16):
    """x: (B, in_size) f32. params follow PyTorch conventions (Linear weight is (out, in))."""
    B, in_size = x.shape
    out_size = params["w1"].shape[0]
    has_skip_weight = params["w_skip"] is not None
    if not has_skip_weight:
        assert in_size == out_size, "identity skip requires in_size == out_size"

    # Pre-transpose Linear weights to (in, out); cast matmul operands to the MXU dtype.
    # Biases stay f32, shaped (1, out) for lane broadcast.
    w1_t = params["w1"].T.astype(matmul_dtype)
    w2_t = params["w2"].T.astype(matmul_dtype)
    b1 = params["b1"].reshape(1, out_size).astype(jnp.float32)
    b2 = params["b2"].reshape(1, out_size).astype(jnp.float32)

    affine_scalars = jnp.stack(
        [params["gain1"][0], params["bias1"][0],
         params["gain2"][0], params["bias2"][0]]).astype(jnp.float32)

    itemsize = np.dtype(matmul_dtype).itemsize
    weight_bytes = (in_size * out_size + out_size * out_size) * itemsize
    if has_skip_weight:
        weight_bytes += in_size * out_size * itemsize

    tile_b = _pick_tile_b(B, in_size, out_size, weight_bytes)
    grid = (pl.cdiv(B, tile_b),)

    # Weights / biases map to block (0, 0) every grid step -> stay resident in VMEM.
    def w_spec(shape):
        return pl.BlockSpec(shape, lambda i, aff: (0, 0))

    in_specs = [pl.BlockSpec((tile_b, in_size), lambda i, aff: (i, 0))]   # x (pipelined)
    operands = [x]
    if has_skip_weight:
        wskip_t = params["w_skip"].T.astype(matmul_dtype)
        in_specs.append(w_spec((in_size, out_size)))
        operands.append(wskip_t)
    in_specs += [w_spec((in_size, out_size)),    # w1^T
                 w_spec((1, out_size)),          # b1
                 w_spec((out_size, out_size)),   # w2^T
                 w_spec((1, out_size))]          # b2
    operands += [w1_t, b1, w2_t, b2]

    flops = 2 * B * out_size * (in_size + out_size + (in_size if has_skip_weight else 0))
    bytes_accessed = int(B * in_size * 4 + B * out_size * 4 + weight_bytes + 2 * out_size * 4)
    cost = pl.CostEstimate(flops=int(flops),
                           transcendentals=int(B * (in_size + out_size)),
                           bytes_accessed=bytes_accessed)

    kernel = functools.partial(_resblock_kernel, has_skip_weight=has_skip_weight)

    return pl.pallas_call(
        kernel,
        out_shape=jax.ShapeDtypeStruct((B, out_size), jnp.float32),
        grid_spec=pltpu.PrefetchScalarGridSpec(
            num_scalar_prefetch=1,           # affine scalars -> SMEM, visible to index maps
            grid=grid,
            in_specs=in_specs,
            out_specs=pl.BlockSpec((tile_b, out_size), lambda i, aff: (i, 0)),
        ),
        compiler_params=pltpu.CompilerParams(dimension_semantics=("parallel",)),
        cost_estimate=cost,
    )(affine_scalars, *operands)


def init_resblock_params(key, in_size, out_size):
    """Deterministic synthetic init matching the shapes of ResBlock.__init__."""
    ks = jax.random.split(key, 5)
    lim1 = 1.0 / np.sqrt(in_size)
    lim2 = 1.0 / np.sqrt(out_size)
    return {
        "w_skip": (None if in_size == out_size else
                   jax.random.uniform(ks[0], (out_size, in_size), jnp.float32, -lim1, lim1)),
        "w1": jax.random.uniform(ks[1], (out_size, in_size), jnp.float32, -lim1, lim1),
        "b1": jax.random.uniform(ks[2], (out_size,), jnp.float32, -lim1, lim1),
        "w2": jax.random.uniform(ks[3], (out_size, out_size), jnp.float32, -lim2, lim2),
        "b2": jax.random.uniform(ks[4], (out_size,), jnp.float32, -lim2, lim2),
        # Affine(): gain = ones(1), bias = zeros(1)
        "gain1": jnp.ones((1,), jnp.float32),
        "bias1": jnp.zeros((1,), jnp.float32),
        "gain2": jnp.ones((1,), jnp.float32),
        "bias2": jnp.zeros((1,), jnp.float32),
    }


def resblock_reference(x, params):
    """Pure-JAX f32 reference for validation."""
    if params["w_skip"] is None:
        xskip = x
    else:
        xskip = x @ params["w_skip"].T
    h1 = jnp.tanh(x * params["gain1"][0] + params["bias1"][0])
    o1 = (h1 @ params["w1"].T + params["b1"]) * INV_SQRT10
    h2 = jnp.tanh(o1 * params["gain2"][0] + params["bias2"][0])
    o2 = (h2 @ params["w2"].T + params["b2"]) * INV_SQRT10 + xskip
    return o2


if __name__ == "__main__":
    key = jax.random.PRNGKey(0)
    k_x1, k_x2, k_p1, k_p2 = jax.random.split(key, 4)

    # Config A: in != out -> skip is a real bias-free Linear (skip matmul path).
    B, in_a, out_a = 64, 64, 128
    x_a = jax.random.normal(k_x1, (B, in_a), jnp.float32)
    params_a = init_resblock_params(k_p1, in_a, out_a)
    ref_a = resblock_reference(x_a, params_a)

    # f32-matmul path: tight structural check.
    out_f32 = jax.block_until_ready(resblock_forward(x_a, params_a, matmul_dtype=jnp.float32))
    np.testing.assert_allclose(np.asarray(out_f32), np.asarray(ref_a), rtol=1e-4, atol=1e-4)

    # Default bf16-matmul path (f32 accumulate): loose check vs the f32 reference.
    out_bf16 = jax.block_until_ready(resblock_forward(x_a, params_a))
    np.testing.assert_allclose(np.asarray(out_bf16), np.asarray(ref_a), rtol=2e-2, atol=2e-2)

    # Config B: in == out -> identity skip (direct VPU add, no skip matmul, no eye()).
    in_b = out_b = 128
    x_b = jax.random.normal(k_x2, (B, in_b), jnp.float32)
    params_b = init_resblock_params(k_p2, in_b, out_b)
    ref_b = resblock_reference(x_b, params_b)
    out_id = jax.block_until_ready(resblock_forward(x_b, params_b))
    np.testing.assert_allclose(np.asarray(out_id), np.asarray(ref_b), rtol=2e-2, atol=2e-2)

    print("KERNEL_OK")
</pallas_src>

<mosaic_0001>
module attributes {stable_mosaic.version = 11 : i64} {
  func.func @_resblock_kernel(%arg0: i32, %arg1: memref<4xf32, #tpu.memory_space<smem>>, %arg2: memref<64x64xf32, #tpu.memory_space<vmem>>, %arg3: memref<64x128xf32, #tpu.memory_space<vmem>>, %arg4: memref<64x128xf32, #tpu.memory_space<vmem>>, %arg5: memref<1x128xf32, #tpu.memory_space<vmem>>, %arg6: memref<128x128xf32, #tpu.memory_space<vmem>>, %arg7: memref<1x128xf32, #tpu.memory_space<vmem>>, %arg8: memref<64x128xf32, #tpu.memory_space<vmem>>) attributes {dimension_semantics = [#tpu.dimension_semantics<parallel>], iteration_bounds = array<i64: 1>, scalar_prefetch = 1 : i64, scratch_operands = 0 : i64, tpu.core_type = #tpu.core_type<tc>, window_params = [{transform_indices = @transform_0, window_bounds = array<i64: 64, 64>}, {pipeline_mode = #tpu.pipeline_mode<synchronous>, transform_indices = @transform_1, window_bounds = array<i64: 64, 128>}, {pipeline_mode = #tpu.pipeline_mode<synchronous>, transform_indices = @transform_2, window_bounds = array<i64: 64, 128>}, {pipeline_mode = #tpu.pipeline_mode<synchronous>, transform_indices = @transform_3, window_bounds = array<i64: 1, 128>}, {pipeline_mode = #tpu.pipeline_mode<synchronous>, transform_indices = @transform_4, window_bounds = array<i64: 128, 128>}, {pipeline_mode = #tpu.pipeline_mode<synchronous>, transform_indices = @transform_5, window_bounds = array<i64: 1, 128>}, {transform_indices = @transform_6, window_bounds = array<i64: 64, 128>}]} {
    %c0 = arith.constant 0 : index
    %0 = memref.load %arg1[%c0] : memref<4xf32, #tpu.memory_space<smem>>
    %c1 = arith.constant 1 : index
    %1 = memref.load %arg1[%c1] : memref<4xf32, #tpu.memory_space<smem>>
    %c2 = arith.constant 2 : index
    %2 = memref.load %arg1[%c2] : memref<4xf32, #tpu.memory_space<smem>>
    %c3 = arith.constant 3 : index
    %3 = memref.load %arg1[%c3] : memref<4xf32, #tpu.memory_space<smem>>
    %c0_0 = arith.constant 0 : index
    %c0_1 = arith.constant 0 : index
    %4 = vector.load %arg2[%c0_0, %c0_1] : memref<64x64xf32, #tpu.memory_space<vmem>>, vector<64x64xf32>
    %5 = vector.broadcast %0 : f32 to vector<64x64xf32>
    %6 = arith.mulf %4, %5 : vector<64x64xf32>
    %7 = vector.broadcast %1 : f32 to vector<64x64xf32>
    %8 = arith.addf %6, %7 : vector<64x64xf32>
    %9 = math.tanh %8 : vector<64x64xf32>
    %c0_2 = arith.constant 0 : index
    %c0_3 = arith.constant 0 : index
    %10 = vector.load %arg4[%c0_2, %c0_3] : memref<64x128xf32, #tpu.memory_space<vmem>>, vector<64x128xf32>
    %cst = arith.constant dense<0.000000e+00> : vector<64x128xf32>
    %11 = tpu.matmul %9, %10, %cst {dimension_numbers = #tpu.dot_dimension_numbers<[1], [0], [0], [1], [0, 0, 1, 1], [], []>} : vector<64x64xf32>, vector<64x128xf32>, vector<64x128xf32> -> vector<64x128xf32>
    %cst_4 = arith.constant 0.316227764 : f32
    %12 = arith.mulf %2, %cst_4 : f32
    %c0_5 = arith.constant 0 : index
    %c0_6 = arith.constant 0 : index
    %13 = vector.load %arg5[%c0_5, %c0_6] : memref<1x128xf32, #tpu.memory_space<vmem>>, vector<1x128xf32>
    %14 = vector.broadcast %12 : f32 to vector<1x128xf32>
    %15 = arith.mulf %13, %14 : vector<1x128xf32>
    %16 = vector.broadcast %3 : f32 to vector<1x128xf32>
    %17 = arith.addf %15, %16 : vector<1x128xf32>
    %18 = vector.broadcast %12 : f32 to vector<64x128xf32>
    %19 = arith.mulf %11, %18 : vector<64x128xf32>
    %20 = vector.broadcast %17 : vector<1x128xf32> to vector<64x128xf32>
    %21 = arith.addf %19, %20 : vector<64x128xf32>
    %22 = math.tanh %21 : vector<64x128xf32>
    %c0_7 = arith.constant 0 : index
    %c0_8 = arith.constant 0 : index
    %23 = vector.load %arg6[%c0_7, %c0_8] : memref<128x128xf32, #tpu.memory_space<vmem>>, vector<128x128xf32>
    %cst_9 = arith.constant dense<0.000000e+00> : vector<64x128xf32>
    %24 = tpu.matmul %22, %23, %cst_9 {dimension_numbers = #tpu.dot_dimension_numbers<[1], [0], [0], [1], [0, 0, 1, 1], [], []>} : vector<64x128xf32>, vector<128x128xf32>, vector<64x128xf32> -> vector<64x128xf32>
    %c0_10 = arith.constant 0 : index
    %c0_11 = arith.constant 0 : index
    %25 = vector.load %arg7[%c0_10, %c0_11] : memref<1x128xf32, #tpu.memory_space<vmem>>, vector<1x128xf32>
    %26 = vector.broadcast %25 : vector<1x128xf32> to vector<64x128xf32>
    %27 = arith.addf %24, %26 : vector<64x128xf32>
    %cst_12 = arith.constant 0.316227764 : f32
    %28 = vector.broadcast %cst_12 : f32 to vector<64x128xf32>
    %29 = arith.mulf %27, %28 : vector<64x128xf32>
    %c0_13 = arith.constant 0 : index
    %c0_14 = arith.constant 0 : index
    %30 = vector.load %arg3[%c0_13, %c0_14] : memref<64x128xf32, #tpu.memory_space<vmem>>, vector<64x128xf32>
    %cst_15 = arith.constant dense<0.000000e+00> : vector<64x128xf32>
    %31 = tpu.matmul %4, %30, %cst_15 {dimension_numbers = #tpu.dot_dimension_numbers<[1], [0], [0], [1], [0, 0, 1, 1], [], []>} : vector<64x64xf32>, vector<64x128xf32>, vector<64x128xf32> -> vector<64x128xf32>
    %32 = arith.addf %29, %31 : vector<64x128xf32>
    %c0_16 = arith.constant 0 : index
    %c0_17 = arith.constant 0 : index
    %33 = vector.load %arg8[%c0_16, %c0_17] : memref<64x128xf32, #tpu.memory_space<vmem>>, vector<64x128xf32>
    tpu.vector_store %arg8[%c0_16, %c0_17], %32 {strides = array<i32>} : memref<64x128xf32, #tpu.memory_space<vmem>>, vector<64x128xf32>,
    return
  }
  func.func @transform_0(%arg0: i32, %arg1: memref<4xf32, #tpu.memory_space<smem>>) -> (i32, i32) {
    %c0_i32 = arith.constant 0 : i32
    %c0_i32_0 = arith.constant 0 : i32
    return %arg0, %c0_i32 : i32, i32
  }
  func.func @transform_1(%arg0: i32, %arg1: memref<4xf32, #tpu.memory_space<smem>>) -> (i32, i32) {
    %c0_i32 = arith.constant 0 : i32
    %c0_i32_0 = arith.constant 0 : i32
    %c0_i32_1 = arith.constant 0 : i32
    return %c0_i32, %c0_i32_0 : i32, i32
  }
  func.func @transform_2(%arg0: i32, %arg1: memref<4xf32, #tpu.memory_space<smem>>) -> (i32, i32) {
    %c0_i32 = arith.constant 0 : i32
    %c0_i32_0 = arith.constant 0 : i32
    %c0_i32_1 = arith.constant 0 : i32
    return %c0_i32, %c0_i32_0 : i32, i32
  }
  func.func @transform_3(%arg0: i32, %arg1: memref<4xf32, #tpu.memory_space<smem>>) -> (i32, i32) {
    %c0_i32 = arith.constant 0 : i32
    %c0_i32_0 = arith.constant 0 : i32
    %c0_i32_1 = arith.constant 0 : i32
    return %c0_i32, %c0_i32_0 : i32, i32
  }
  func.func @transform_4(%arg0: i32, %arg1: memref<4xf32, #tpu.memory_space<smem>>) -> (i32, i32) {
    %c0_i32 = arith.constant 0 : i32
    %c0_i32_0 = arith.constant 0 : i32
    %c0_i32_1 = arith.constant 0 : i32
    return %c0_i32, %c0_i32_0 : i32, i32
  }
  func.func @transform_5(%arg0: i32, %arg1: memref<4xf32, #tpu.memory_space<smem>>) -> (i32, i32) {
    %c0_i32 = arith.constant 0 : i32
    %c0_i32_0 = arith.constant 0 : i32
    %c0_i32_1 = arith.constant 0 : i32
    return %c0_i32, %c0_i32_0 : i32, i32
  }
  func.func @transform_6(%arg0: i32, %arg1: memref<4xf32, #tpu.memory_space<smem>>) -> (i32, i32) {
    %c0_i32 = arith.constant 0 : i32
    %c0_i32_0 = arith.constant 0 : i32
    return %arg0, %c0_i32 : i32, i32
  }
}

</mosaic_0001>

<bundles_post_ra>
// kernel: tpu_custom_call.1
= control target key start
LH: loop header
LB: loop body
LE: loop exit
PB: predicated region body
PF: predicated region fallthrough
CT: control target
= control target key end

     0   :  { %s1217_s0 = inlined_call_operand.hbm [shape: f32[4], index: 0, kind: input, shape index: {}]   ;;  %s1218_s1 = inlined_call_operand.hbm [shape: f32[64,64], index: 1, kind: input, shape index: {}]   ;;  %s1219_s2 = inlined_call_operand.hbm [shape: f32[64,128], index: 2, kind: input, shape index: {}]   ;;  %s1220_s3 = inlined_call_operand.hbm [shape: f32[64,128], index: 3, kind: input, shape index: {}]   ;;  %s1221_s4 = inlined_call_operand.vmem [shape: f32[1,128], index: 4, kind: input, shape index: {}]   ;;  %s1222_s5 = inlined_call_operand.hbm [shape: f32[128,128], index: 5, kind: input, shape index: {}]   ;;  %s1223_s6 = inlined_call_operand.vmem [shape: f32[1,128], index: 6, kind: input, shape index: {}]   ;;  %s1224_s7 = inlined_call_operand.hbm [shape: f32[64,128], index: 7, kind: output, shape index: {}]  }
   0x1   :  { %s884_s26 = scalar_lea.hbm %s1217_s0, 16 }
   0x2   :  { %p885_p0 = scmp.ne.s32.totalorder %s1217_s0, %s884_s26  ;;  %p888_p1 = scmp.lt.u32.totalorder %s884_s26, %s1217_s0 }
   0x4   :  { %p890_p2 = pnand %p888_p1, %p885_p0 }
   0x6   :  { %893 = shalt.err (!%p890_p2)  }
   0x7   :  { %s1014_s8 = smov [#allocation3]  }
   0x8   :  { %13 = dma.hbm_to_smem %s1217_s0, 16, %s1014_s8, [#allocation2] }
   0x9   :  { %1004 = dma.done.wait [#allocation2], 16 }
   0xa   :  { %1005 = vsyncadd [#allocation2], 4294967280 }
   0xb   :  { %15 = sfence }
   0xc   :  { %16 = vsyncpa [#allocation5], 0 }
   0xd   :  { %17 = vsyncpa [#allocation8], 0 }
   0xe   :  { %18 = vsyncpa [#allocation11], 0 }
   0xf   :  { %19 = vsyncpa [#allocation6], 0  ;;  %s1015_s11 = smov [#allocation7]   ;;  %s1016_s13 = smov [#allocation4]  }
  0x10   :  { %s37_s12 = sshll.u32 %s1015_s11, 4  ;;  %s25_s14 = sshll.u32 %s1016_s13, 4  ;;  %s38_s12 = int_to_ptr.vmem [resolvable:$true] %s37_s12  ;;  %s1074_s14 = int_to_ptr.vmem [resolvable:$true] %s25_s14 }
  0x11   :  { %s894_s17 = scalar_lea.hbm %s1219_s2, 1024 }
  0x12   :  { %p895_p3 = scmp.ne.s32.totalorder %s1219_s2, %s894_s17  ;;  %p898_p4 = scmp.lt.u32.totalorder %s894_s17, %s1219_s2 }
  0x14   :  { %p900_p5 = pnand %p898_p4, %p895_p3 }
  0x16   :  { %903 = shalt.err (!%p900_p5)
}
  0x17   :  { %s904_s21 = scalar_lea.vmem %s38_s12, 1024  ;;  %p909_p7 = scmp.lt.s32.totalorder %s38_s12, %s38_s12 }
  0x18   :  { %p905_p6 = scmp.ne.s32.totalorder %s38_s12, %s904_s21  ;;  %p910_p8 = scmp.lt.s32.totalorder %s904_s21, %s904_s21 }
  0x1a   :  { %p911_p9 = por %p910_p8, %p909_p7 }
  0x1c   :  { %p912_p10 = pnand %p911_p9, %p905_p6 }
  0x1e   :  { %915 = shalt.err (!%p912_p10)
}
  0x1f   :  { %s1017_s22 = smov 128   ;;  %s1018_s23 = smov 8  }
  0x20   :  { %43 = dma.hbm_to_vmem [thread:$0]  %s1219_s2, 1024, %s38_s12, [#allocation8], %s1017_s22, %s1017_s22, %s1018_s23  }
  0x21   :  { %s916_s28 = scalar_lea.hbm %s1218_s1, 1024 }
  0x22   :  { %p917_p11 = scmp.ne.s32.totalorder %s1218_s1, %s916_s28  ;;  %p920_p12 = scmp.lt.u32.totalorder %s916_s28, %s1218_s1 }
  0x24   :  { %p922_p13 = pnand %p920_p12, %p917_p11 }
  0x26   :  { %925 = shalt.err (!%p922_p13)
}
  0x27   :  { %s926_s10 = scalar_lea.vmem %s1074_s14, 1024  ;;  %p931_p1 = scmp.lt.s32.totalorder %s1074_s14, %s1074_s14 }
  0x28   :  { %p927_p0 = scmp.ne.s32.totalorder %s1074_s14, %s926_s10  ;;  %p932_p2 = scmp.lt.s32.totalorder %s926_s10, %s926_s10 }
  0x2a   :  { %p933_p3 = por %p932_p2, %p931_p1 }
  0x2c   :  { %p934_p4 = pnand %p933_p3, %p927_p0 }
  0x2e   :  { %937 = shalt.err (!%p934_p4)
}
  0x2f   :  { %31 = dma.hbm_to_vmem [thread:$0]  %s1218_s1, 1024, %s1074_s14, [#allocation5], %s1017_s22, %s1017_s22, %s1018_s23  }
  0x30   :  { %s1019_s12 = smov [#allocation9]   ;;  %s1020_s15 = smov [#allocation10]  }
  0x31   :  { %s49_s13 = sshll.u32 %s1019_s12, 4  ;;  %s63_s16 = sshll.u32 %s1020_s15, 4  ;;  %s50_s13 = int_to_ptr.vmem [resolvable:$true] %s49_s13  ;;  %s1111_s16 = int_to_ptr.vmem [resolvable:$true] %s63_s16 }
  0x32   :  { %s938_s0 = scalar_lea.hbm %s1220_s3, 1024 }
  0x33   :  { %p939_p5 = scmp.ne.s32.totalorder %s1220_s3, %s938_s0  ;;  %p942_p6 = scmp.lt.u32.totalorder %s938_s0, %s1220_s3 }
  0x35   :  { %p944_p7 = pnand %p942_p6, %p939_p5 }
  0x37   :  { %947 = shalt.err (!%p944_p7)
}
  0x38   :  { %s948_s1 = scalar_lea.vmem %s50_s13, 1024  ;;  %p953_p9 = scmp.lt.s32.totalorder %s50_s13, %s50_s13 }
  0x39   :  { %p949_p8 = scmp.ne.s32.totalorder %s50_s13, %s948_s1  ;;  %p954_p10 = scmp.lt.s32.totalorder %s948_s1, %s948_s1 }
  0x3b   :  { %p955_p11 = por %p954_p10, %p953_p9 }
  0x3d   :  { %p956_p12 = pnand %p955_p11, %p949_p8 }
  0x3f   :  { %959 = shalt.err (!%p956_p12)
}
  0x40   :  { %55 = dma.hbm_to_vmem [thread:$0]  %s1220_s3, 1024, %s50_s13, [#allocation8], %s1017_s22, %s1017_s22, %s1018_s23  }
  0x41   :  { %s960_s28 = scalar_lea.hbm %s1222_s5, 2048 }
  0x42   :  { %p961_p13 = scmp.ne.s32.totalorder %s1222_s5, %s960_s28  ;;  %p964_p0 = scmp.lt.u32.totalorder %s960_s28, %s1222_s5 }
  0x44   :  { %p966_p1 = pnand %p964_p0, %p961_p13 }
  0x46   :  { %969 = shalt.err (!%p966_p1)
}
  0x47   :  { %s970_s10 = scalar_lea.vmem %s1111_s16, 2048  ;;  %p975_p3 = scmp.lt.s32.totalorder %s1111_s16, %s1111_s16 }
  0x48   :  { %p971_p2 = scmp.ne.s32.totalorder %s1111_s16, %s970_s10  ;;  %p976_p4 = scmp.lt.s32.totalorder %s970_s10, %s970_s10 }
  0x4a   :  { %p977_p5 = por %p976_p4, %p975_p3 }
  0x4c   :  { %p978_p6 = pnand %p977_p5, %p971_p2 }
  0x4e   :  { %981 = shalt.err (!%p978_p6)
}
  0x4f   :  { %69 = dma.hbm_to_vmem [thread:$0]  %s1222_s5, 2048, %s1111_s16, [#allocation11], %s1017_s22, %s1017_s22, %s1018_s23  }
  0x50   :  { %1006 = dma.done.wait [#allocation5], 1024  }
  0x51   :  { %1007 = vsyncadd [#allocation5], 4294966272 }
  0x52   :  { %1008 = dma.done.wait [#allocation8], 2048  }
  0x53   :  { %1009 = vsyncadd [#allocation8], 4294965248 }
  0x54   :  { %1010 = dma.done.wait [#allocation11], 2048  }
  0x55   :  { %1011 = vsyncadd [#allocation11], 4294965248  ;;  %s84_s11 = sld [smem:[#allocation3]]  ;;  %s604_s12 = sld [smem:[#allocation3 + $0x1]]  ;;  %v122_v0 = vld [vmem:[#allocation9] sm:$0xff]  ;;  %v123_v1 = vld [vmem:[#allocation9 + $0x8] sm:$0xff] }
  0x56   :  { %v124_v2 = vld [vmem:[#allocation9 + $0x10] sm:$0xff]  ;;  %v780_v4 = vpack.c.bf16 %v123_v1, %v122_v0  ;;  %v125_v5 = vld [vmem:[#allocation9 + $0x18] sm:$0xff]  ;;  %v126_v7 = vld [vmem:[#allocation9 + $0x20] sm:$0xff]  ;;  %vm130_vm0 = vcmask 523264   ;;  %s605_s5 = sld [smem:[#allocation3 + $0x2]]  ;;  %s606_s13 = sld [smem:[#allocation3 + $0x3]] }
  0x57   :  { %v784_v6 = vpack.c.bf16 %v125_v5, %v124_v2  ;;  %v127_v8 = vld [vmem:[#allocation9 + $0x28] sm:$0xff]  ;;  %v1148_v9 = vld [vmem:[#allocation4] sm:$0xff]  ;;  %v1152_v12 = vld [vmem:[#allocation4 + $0x10] sm:$0xff] }
  0x58   :  { %781 = vmatprep.subr.bf16.mxu0 %v780_v4  ;;  %v1150_v11 = vld [vmem:[#allocation4 + $0x8] sm:$0xff]  ;;  %v1154_v13 = vld [vmem:[#allocation4 + $0x18] sm:$0xff]  ;;  %v1157_v15 = vld [vmem:[#allocation4 + $0x20] sm:$0xff]  ;;  %v788_v21 = vpack.c.bf16 %v127_v8, %v126_v7 }
  0x59   :  { %783 = vmatpush3.bf16.msra.mxu0 %v780_v4  ;;  %v1159_v16 = vld [vmem:[#allocation4 + $0x28] sm:$0xff]  ;;  %v1161_v17 = vld [vmem:[#allocation4 + $0x30] sm:$0xff]  ;;  %v296_v25 = vld [vmem:[#allocation10] sm:$0xff] }
  0x5a   :  { %785 = vmatprep.subr.bf16.mxu0 %v784_v6  ;;  %v128_v22 = vld [vmem:[#allocation9 + $0x30] sm:$0xff]  ;;  %v297_v26 = vld [vmem:[#allocation10 + $0x8] sm:$0xff]  ;;  %v129_v27 = vld [vmem:[#allocation9 + $0x38] sm:$0xff] }
  0x5b   :  { %v96_v3 = vstv %s84_s11  ;;  %v105_v10 = vstv %s604_s12  ;;  %v298_v32 = vld [vmem:[#allocation10 + $0x10] sm:$0xff]  ;;  %v299_v33 = vld [vmem:[#allocation10 + $0x18] sm:$0xff]  ;;  %v796_v37 = vpack.c.bf16 %v297_v26, %v296_v25  ;;  %v792_v39 = vpack.c.bf16 %v129_v27, %v128_v22  ;;  %v300_v40 = vld [vmem:[#allocation10 + $0x20] sm:$0xff] }
  0x5c   :  { %v97_v14 = vmul.f32 %v96_v3, %v1148_v9  ;;  %v98_v18 = vmul.f32 %v96_v3, %v1150_v11  ;;  %v99_v19 = vmul.f32 %v96_v3, %v1152_v12  ;;  %v100_v20 = vmul.f32 %v96_v3, %v1154_v13  ;;  %v1168_v34 = vld [vmem:[#allocation4 + $0x38] sm:$0xff]  ;;  %v301_v41 = vld [vmem:[#allocation10 + $0x28] sm:$0xff]  ;;  %v302_v46 = vld [vmem:[#allocation10 + $0x30] sm:$0xff]  ;;  %s260_s15 = smul.f32 0.31622776, %s605_s5 }
  0x5d   :  { %v101_v23 = vmul.f32 %v96_v3, %v1157_v15  ;;  %v102_v28 = vmul.f32 %v96_v3, %v1159_v16  ;;  %v103_v35 = vmul.f32 %v96_v3, %v1161_v17  ;;  %787 = vmatpush3.bf16.msra.mxu0 %v784_v6  ;;  %v800_v38 = vpack.c.bf16 %v299_v33, %v298_v32  ;;  %v303_v47 = vld [vmem:[#allocation10 + $0x38] sm:$0xff]  ;;  %v304_v58 = vld [vmem:[#allocation10 + $0x40] sm:$0xff]  ;;  %v305_v59 = vld [vmem:[#allocation10 + $0x48] sm:$0xff] }
  0x5e   :  { %v106_v24 = vadd.f32 %v105_v10, %v97_v14  ;;  %v107_v29 = vadd.f32 %v105_v10, %v98_v18  ;;  %v108_v30 = vadd.f32 %v105_v10, %v99_v19  ;;  %v109_v31 = vadd.f32 %v105_v10, %v100_v20  ;;  %789 = vmatprep.subr.bf16.mxu0 %v788_v21  ;;  %v432_v61 = vld [vmem:[#allocation7] sm:$0xff]  ;;  %v433_v62 = vld [vmem:[#allocation7 + $0x8] sm:$0xff]  ;;  %v306_v0 = vld [vmem:[#allocation10 + $0x50] sm:$0xff] }
  0x5f   :  { %v110_v36 = vadd.f32 %v105_v10, %v101_v23  ;;  %v104_v42 = vmul.f32 %v96_v3, %v1168_v34  ;;  %v111_v43 = vadd.f32 %v105_v10, %v102_v28  ;;  %797 = vmatprep.subr.bf16.mxu1 %v796_v37  ;;  %v112_v44 = vadd.f32 %v105_v10, %v103_v35  ;;  %v307_v1 = vld [vmem:[#allocation10 + $0x58] sm:$0xff]  ;;  %v434_v3 = vld [vmem:[#allocation7 + $0x10] sm:$0xff]  ;;  %v308_v6 = vld [vmem:[#allocation10 + $0x60] sm:$0xff] }
  0x60   :  { %852 = vtanh.f32 %v106_v24  ;;  %799 = vmatpush3.bf16.msra.mxu1 %v796_v37  ;;  %v804_v45 = vpack.c.bf16 %v301_v41, %v300_v40  ;;  %v808_v49 = vpack.c.bf16 %v303_v47, %v302_v46  ;;  %v812_v60 = vpack.c.bf16 %v305_v59, %v304_v58  ;;  %v435_v4 = vld [vmem:[#allocation7 + $0x18] sm:$0xff]  ;;  %v309_v7 = vld [vmem:[#allocation10 + $0x68] sm:$0xff]  ;;  %v310_v18 = vld [vmem:[#allocation10 + $0x70] sm:$0xff] }
  0x61   :  { %854 = vtanh.f32 %v107_v29  ;;  %791 = vmatpush3.bf16.msra.mxu0 %v788_v21  ;;  %801 = vmatprep.subr.bf16.mxu1 %v800_v38  ;;  %v113_v48 = vadd.f32 %v105_v10, %v104_v42  ;;  %v828_v63 = vpack.c.bf16 %v433_v62, %v432_v61  ;;  %v816_v2 = vpack.c.bf16 %v307_v1, %v306_v0  ;;  %v437_v10 = vld [vmem:[#allocation7 + $0x28] sm:$0xff]  ;;  %v311_v19 = vld [vmem:[#allocation10 + $0x78] sm:$0xff]  ;;  %v438_v21 = vld [vmem:[#allocation7 + $0x30] sm:$0xff] }
  0x62   :  { %856 = vtanh.f32 %v108_v30  ;;  %793 = vmatprep.subr.bf16.mxu0 %v792_v39  ;;  %v832_v5 = vpack.c.bf16 %v435_v4, %v434_v3  ;;  %v820_v8 = vpack.c.bf16 %v309_v7, %v308_v6  ;;  %v824_v20 = vpack.c.bf16 %v311_v19, %v310_v18  ;;  %v439_v22 = vld [vmem:[#allocation7 + $0x38] sm:$0xff]  ;;  %v615_v3 = vld [vmem:[%s1223_s6] ss:$0 sm:$0xff]  ;;  %s1021_s6 = smov [#allocation12]  }
  0x63   :  { %858 = vtanh.f32 %v109_v31  ;;  %v840_v23 = vpack.c.bf16 %v439_v22, %v438_v21  ;;  %v264_v25 = vstv %s606_s13  ;;  %s590_s0 = sshll.u32 %s1021_s6, 4  ;;  %s591_s0 = int_to_ptr.vmem [resolvable:$true] %s590_s0 }
  0x64   :  { %860 = vtanh.f32 %v110_v36  ;;  %803 = vmatpush3.bf16.msra.mxu1 %v800_v38  ;;  %s982_s19 = scalar_lea.vmem %s591_s0, 1024  ;;  %p987_p8 = scmp.lt.s32.totalorder %s591_s0, %s591_s0 }
  0x65   :  { %862 = vtanh.f32 %v111_v43  ;;  %795 = vmatpush3.bf16.msra.mxu0 %v792_v39  ;;  %805 = vmatprep.subr.bf16.mxu1 %v804_v45  ;;  %p983_p7 = scmp.ne.s32.totalorder %s591_s0, %s982_s19  ;;  %p988_p9 = scmp.lt.s32.totalorder %s982_s19, %s982_s19 }
  0x66   :  { %864 = vtanh.f32 %v112_v44  ;;  %829 = vmatprep.subr.bf16.mxu0 %v828_v63 }
  0x67   :  { %866 = vtanh.f32 %v113_v48  ;;  %p989_p10 = por %p988_p9, %p987_p8 }
  0x68   :  { %807 = vmatpush3.bf16.msra.mxu1 %v804_v45 }
  0x69   :  { %809 = vmatprep.subr.bf16.mxu1 %v808_v49  ;;  %p990_p11 = pnand %p989_p10, %p983_p7 }
  0x6a   :  { %v853_v50 = vpop.eup %852 }
  0x6b   :  { %v855_v51 = vpop.eup %854  ;;  %696 = vmatprep.mubr.msk.f32.mxu0 %vm130_vm0, %v853_v50 }
  0x6c   :  { %v857_v52 = vpop.eup %856  ;;  %697 = vmatmul.mubr.msk.f32.vlgmr.msra.gmra.mrb[0].mxu0 %vm130_vm0, %v855_v51  ;;  %811 = vmatpush3.bf16.msra.mxu1 %v808_v49 }
  0x6d   :  { %v859_v53 = vpop.eup %858  ;;  %699 = vmatprep.mubr.msk.f32.mxu0 %vm130_vm0, %v857_v52  ;;  %813 = vmatprep.subr.bf16.mxu1 %v812_v60 }
  0x6e   :  { %v861_v54 = vpop.eup %860  ;;  %831 = vmatpush3.bf16.msra.mxu0 %v828_v63 }
  0x6f   :  { %v863_v55 = vpop.eup %862  ;;  %833 = vmatprep.subr.bf16.mxu0 %v832_v5 }
  0x70   :  { %700 = vmatmul.mubr.msk.f32.gmra.mrb[2].mxu0 %vm130_vm0, %v859_v53  ;;  %v865_v56 = vpop.eup %864  ;;  %815 = vmatpush3.bf16.msra.mxu1 %v812_v60 }
  0x71   :  { %702 = vmatprep.mubr.msk.f32.mxu0 %vm130_vm0, %v861_v54  ;;  %v867_v57 = vpop.eup %866  ;;  %817 = vmatprep.subr.bf16.mxu1 %v816_v2 }
  0x72   :  { %835 = vmatpush3.bf16.msra.mxu0 %v832_v5 }
  0x74   :  { %703 = vmatmul.mubr.msk.f32.gmra.mrb[4].mxu0 %vm130_vm0, %v863_v55  ;;  %819 = vmatpush3.bf16.msra.mxu1 %v816_v2 }
  0x75   :  { %705 = vmatprep.mubr.msk.f32.mxu0 %vm130_vm0, %v865_v56  ;;  %821 = vmatprep.subr.bf16.mxu1 %v820_v8 }
  0x78   :  { %706 = vmatmul.mubr.msk.f32.gmra.mrb[6].mxu0 %vm130_vm0, %v867_v57  ;;  %823 = vmatpush3.bf16.msra.mxu1 %v820_v8 }
  0x79   :  { %768 = vmatprep.mubr.msk.f32.mxu0 %vm130_vm0, %v1148_v9  ;;  %v436_v9 = vld [vmem:[#allocation7 + $0x20] sm:$0xff]  ;;  %825 = vmatprep.subr.bf16.mxu1 %v824_v20 }
  0x7a   :  { %v836_v14 = vpack.c.bf16 %v437_v10, %v436_v9 }
  0x7c   :  { %837 = vmatprep.subr.bf16.mxu0 %v836_v14  ;;  %827 = vmatpush3.bf16.msra.mxu1 %v824_v20 }
  0x7d   :  { %839 = vmatpush3.bf16.msra.mxu0 %v836_v14 }
  0x7e   :  { %841 = vmatprep.subr.bf16.mxu0 %v840_v23 }
  0x81   :  { %843 = vmatpush3.bf16.msra.mxu0 %v840_v23 }
  0x84   :  { %769 = vmatmul.mubr.msk.f32.vlgmr.msra.gmra.mrb[8].mxu0 %vm130_vm0, %v1150_v11  ;;  %v275_v11 = vlaneseq }
  0x85   :  { %771 = vmatprep.mubr.msk.f32.mxu0 %vm130_vm0, %v1152_v12  ;;  %v261_v12 = vld [vmem:[%s1221_s4] sm:$0x1] }
  0x88   :  { %772 = vmatmul.mubr.msk.f32.gmra.mrb[10].mxu0 %vm130_vm0, %v1154_v13  ;;  %v262_v13 = vstv %s260_s15 }
  0x89   :  { %774 = vmatprep.mubr.msk.f32.mxu0 %vm130_vm0, %v1157_v15  ;;  %v263_v24 = vmul.f32 %v262_v13, %v261_v12  ;;  %v276_v15 = vshrl.u32 %v275_v11, 7 }
  0x8b   :  { %v265_v26 = vadd.f32 %v264_v25, %v263_v24 }
  0x8c   :  { %775 = vmatmul.mubr.msk.f32.gmra.mrb[12].mxu0 %vm130_vm0, %v1159_v16  ;;  %v277_v16 = vsub.s32 0, %v276_v15 }
  0x8d   :  { %777 = vmatprep.mubr.msk.f32.mxu0 %vm130_vm0, %v1161_v17 }
  0x8e   :  { %v278_v27 = vrot.slane %v265_v26, %v277_v16 }
  0x90   :  { %778 = vmatmul.mubr.msk.f32.gmra.mrb[14].mxu0 %vm130_vm0, %v1168_v34 }
 0x13f   :  { %v698_v28 = vpop.f32.mrb[0].mxu0 }
 0x140   :  { %v267_v17 = vmul.f32 %v698_v28, %v262_v13  ;;  %v221_v29 = vpop.f32.mrb[1].mxu0 }
 0x141   :  { %v266_v30 = vmul.f32 %v262_v13, %v221_v29 }
 0x142   :  { %v281_v31 = vadd.f32 %v278_v27, %v267_v17 }
 0x143   :  { %v280_v32 = vadd.f32 %v278_v27, %v266_v30  ;;  %v701_v33 = vpop.f32.mrb[2].mxu0 }
 0x144   :  { %v269_v34 = vmul.f32 %v701_v33, %v262_v13  ;;  %v231_v35 = vpop.f32.mrb[3].mxu0 }
 0x145   :  { %v268_v36 = vmul.f32 %v262_v13, %v231_v35  ;;  %868 = vtanh.f32 %v280_v32 }
 0x146   :  { %870 = vtanh.f32 %v281_v31  ;;  %v283_v37 = vadd.f32 %v278_v27, %v269_v34 }
 0x147   :  { %v282_v38 = vadd.f32 %v278_v27, %v268_v36  ;;  %v704_v39 = vpop.f32.mrb[4].mxu0 }
 0x148   :  { %v271_v40 = vmul.f32 %v704_v39, %v262_v13  ;;  %v241_v41 = vpop.f32.mrb[5].mxu0 }
 0x149   :  { %872 = vtanh.f32 %v282_v38  ;;  %v270_v42 = vmul.f32 %v262_v13, %v241_v41 }
 0x14a   :  { %874 = vtanh.f32 %v283_v37  ;;  %v285_v43 = vadd.f32 %v278_v27, %v271_v40 }
 0x14b   :  { %v284_v44 = vadd.f32 %v278_v27, %v270_v42  ;;  %v707_v45 = vpop.f32.mrb[6].mxu0 }
 0x14c   :  { %v273_v46 = vmul.f32 %v707_v45, %v262_v13  ;;  %v251_v47 = vpop.f32.mrb[7].mxu0 }
 0x14d   :  { %876 = vtanh.f32 %v284_v44  ;;  %v272_v48 = vmul.f32 %v262_v13, %v251_v47 }
 0x14e   :  { %878 = vtanh.f32 %v285_v43  ;;  %v287_v49 = vadd.f32 %v278_v27, %v273_v46 }
 0x14f   :  { %v869_v50 = vpop.eup %868  ;;  %v286_v51 = vadd.f32 %v278_v27, %v272_v48 }
 0x150   :  { %v871_v52 = vpop.eup %870  ;;  %740 = vmatprep.mubr.f32.mxu1 %v869_v50 }
 0x151   :  { %880 = vtanh.f32 %v286_v51  ;;  %741 = vmatmul.mubr.f32.vlgmr.msra.gmra.mrb[0].mxu1 %v871_v52 }
 0x152   :  { %882 = vtanh.f32 %v287_v49 }
 0x153   :  { %v873_v53 = vpop.eup %872 }
 0x154   :  { %v875_v54 = vpop.eup %874  ;;  %743 = vmatprep.mubr.f32.mxu1 %v873_v53 }
 0x155   :  { %744 = vmatmul.mubr.f32.gmra.mrb[2].mxu1 %v875_v54 }
 0x157   :  { %v877_v55 = vpop.eup %876  ;;  %v770_v59 = vpop.f32.mrb[8].mxu0 }
 0x158   :  { %v879_v56 = vpop.eup %878  ;;  %746 = vmatprep.mubr.f32.mxu1 %v877_v55  ;;  %v530_v60 = vpop.f32.mrb[9].mxu0 }
 0x159   :  { %747 = vmatmul.mubr.f32.gmra.mrb[4].mxu1 %v879_v56 }
 0x15b   :  { %v881_v57 = vpop.eup %880  ;;  %v773_v61 = vpop.f32.mrb[10].mxu0 }
 0x15c   :  { %v883_v58 = vpop.eup %882  ;;  %749 = vmatprep.mubr.f32.mxu1 %v881_v57  ;;  %v540_v62 = vpop.f32.mrb[11].mxu0 }
 0x15d   :  { %750 = vmatmul.mubr.f32.gmra.mrb[6].mxu1 %v883_v58 }
 0x15f   :  { %v776_v63 = vpop.f32.mrb[12].mxu0 }
 0x160   :  { %v550_v0 = vpop.f32.mrb[13].mxu0 }
 0x163   :  { %v779_v1 = vpop.f32.mrb[14].mxu0 }
 0x164   :  { %v560_v2 = vpop.f32.mrb[15].mxu0 }
 0x224   :  { %v742_v4 = vpop.f32.mrb[0].mxu1 }
 0x225   :  { %v391_v5 = vadd.f32 %v742_v4, %v615_v3  ;;  %v385_v6 = vpop.f32.mrb[1].mxu1 }
 0x226   :  { %v386_v7 = vadd.f32 %v615_v3, %v385_v6 }
 0x227   :  { %v425_v8 = vmul.f32 0.31622776, %v391_v5 }
 0x228   :  { %v424_v9 = vmul.f32 0.31622776, %v386_v7  ;;  %v745_v10 = vpop.f32.mrb[2].mxu1 }
 0x229   :  { %v570_v14 = vadd.f32 %v770_v59, %v425_v8  ;;  %v401_v18 = vadd.f32 %v745_v10, %v615_v3  ;;  %v395_v19 = vpop.f32.mrb[3].mxu1 }
 0x22a   :  { %v569_v20 = vadd.f32 %v530_v60, %v424_v9  ;;  %v396_v21 = vadd.f32 %v615_v3, %v395_v19 }
 0x22b   :  { %578 = vst [vmem:[#allocation12 + $0x8] sm:$0xff] %v570_v14  ;;  %v427_v22 = vmul.f32 0.31622776, %v401_v18 }
 0x22c   :  { %577 = vst [vmem:[#allocation12] sm:$0xff] %v569_v20  ;;  %v426_v23 = vmul.f32 0.31622776, %v396_v21  ;;  %v748_v11 = vpop.f32.mrb[4].mxu1 }
 0x22d   :  { %v572_v12 = vadd.f32 %v773_v61, %v427_v22  ;;  %v411_v13 = vadd.f32 %v748_v11, %v615_v3  ;;  %v405_v24 = vpop.f32.mrb[5].mxu1 }
 0x22e   :  { %v571_v15 = vadd.f32 %v540_v62, %v426_v23  ;;  %v406_v25 = vadd.f32 %v615_v3, %v405_v24 }
 0x22f   :  { %580 = vst [vmem:[#allocation12 + $0x18] sm:$0xff] %v572_v12  ;;  %v429_v26 = vmul.f32 0.31622776, %v411_v13 }
 0x230   :  { %579 = vst [vmem:[#allocation12 + $0x10] sm:$0xff] %v571_v15  ;;  %v428_v16 = vmul.f32 0.31622776, %v406_v25  ;;  %v751_v27 = vpop.f32.mrb[6].mxu1 }
 0x231   :  { %v574_v28 = vadd.f32 %v776_v63, %v429_v26  ;;  %v421_v17 = vadd.f32 %v751_v27, %v615_v3  ;;  %v415_v29 = vpop.f32.mrb[7].mxu1 }
 0x232   :  { %v573_v30 = vadd.f32 %v550_v0, %v428_v16  ;;  %v416_v31 = vadd.f32 %v615_v3, %v415_v29 }
 0x233   :  { %582 = vst [vmem:[#allocation12 + $0x28] sm:$0xff] %v574_v28  ;;  %v431_v32 = vmul.f32 0.31622776, %v421_v17 }
 0x234   :  { %581 = vst [vmem:[#allocation12 + $0x20] sm:$0xff] %v573_v30  ;;  %v430_v33 = vmul.f32 0.31622776, %v416_v31 }
 0x235   :  { %v576_v34 = vadd.f32 %v779_v1, %v431_v32 }
 0x236   :  { %v575_v35 = vadd.f32 %v560_v2, %v430_v33 }
 0x237   :  { %584 = vst [vmem:[#allocation12 + $0x38] sm:$0xff] %v576_v34 }
 0x238   :  { %583 = vst [vmem:[#allocation12 + $0x30] sm:$0xff] %v575_v35 }
 0x239   :  { %993 = shalt.err (!%p990_p11)
}
 0x23a   :  { %s994_s24 = scalar_lea.hbm %s1224_s7, 1024 }
 0x23b   :  { %p995_p12 = scmp.ne.s32.totalorder %s1224_s7, %s994_s24  ;;  %p998_p13 = scmp.lt.u32.totalorder %s994_s24, %s1224_s7 }
 0x23d   :  { %p1000_p0 = pnand %p998_p13, %p995_p12 }
 0x23f   :  { %1003 = shalt.err (!%p1000_p0)
}
 0x240   :  { %596 = dma.vmem_to_hbm [thread:$0]  %s591_s0, 1024, %s1224_s7, [#allocation6], %s1017_s22, %s1017_s22, %s1018_s23  }
 0x241   :  { %1012 = dma.done.wait [#allocation6], 1024  }
 0x242   :  { %1013 = vsyncadd [#allocation6], 4294966272 }
 0x243   :  { %600 = vsyncpa [#allocation5], 1 }
 0x244   :  { %601 = vsyncpa [#allocation8], 1 }
 0x245   :  { %602 = vsyncpa [#allocation11], 1 }
 0x246   :  { %603 = vsyncpa [#allocation6], 1 }

</bundles_post_ra>
